<compile_context>
chip_gen: v5e
topology: v5e:2x2
jax: 0.10.0
libtpu: 0.0.40
codegen_flags: <defaults>
</compile_context>

<pallas_src>
import jax
import jax.numpy as jnp
from jax.experimental import pallas as pl
from jax.experimental.pallas import tpu as pltpu


def _round_up(x, m):
    return ((x + m - 1) // m) * m


def _make_kernel(h_chunk, n_chunks):
    def kernel(z0_ref, z1_ref, ffw_ref, ffb_ref,
               w1c_ref, w1d_ref, b1_ref, w2_ref, b2_ref,
               out_ref):
        z0 = z0_ref[...]                                      # (TB, D) f32
        z1 = z1_ref[...]                                      # (TB, D) f32
        tb = z0.shape[0]

        # context = relu(z0 @ ffw + ffb): N=1 contraction done as a VPU
        # multiply + lane reduction (keeps the MXU free).  f32 throughout.
        ctx = jnp.sum(z0 * ffw_ref[...], axis=-1, keepdims=True) + ffb_ref[0, 0]
        ctx = jnp.maximum(ctx, 0.0)                           # (TB, 1) f32

        # bf16 MXU operand; accumulation below is f32.
        diff = (z1 - z0).astype(jnp.bfloat16)                 # (TB, D)

        # hidden = relu([ctx, diff] @ W1 + b1)
        #        = relu(diff @ W1[1:, :] + ctx * W1[0, :] + b1)
        # processed in h_chunk-wide lane slices; pred accumulates per chunk so
        # the full (TB, H) hidden never exists as a VMEM temporary.
        pred = jnp.zeros((tb, 1), jnp.float32)
        for c in range(n_chunks):                             # static 4-iter loop
            sl = slice(c * h_chunk, (c + 1) * h_chunk)
            h_pre = jnp.dot(diff, w1d_ref[:, sl],
                            preferred_element_type=jnp.float32)   # MXU (TB, HC)
            h_pre = h_pre + ctx * w1c_ref[:, sl] + b1_ref[:, sl]
            hidden = jnp.maximum(h_pre, 0.0)                  # f32 VPU
            # pred += hidden @ w2_chunk: VPU multiply + lane reduction.
            pred = pred + jnp.sum(hidden * w2_ref[:, sl], axis=-1, keepdims=True)

        out_ref[...] = pred + b2_ref[0, 0]                    # (TB, 1)
        # TODO(synk): emit pred as a lane-dense (1, TB) row per step; skipped
        # because the in-kernel (TB,1)->(1,TB) relayout is a lowering risk and
        # the writeback is only TB*4 bytes/step.

    return kernel


def contrastive_forward(z0, z1, params, block_b=512, h_chunk=256):
    """Pallas forward pass. params hold PyTorch-layout weights (x @ W + b)."""
    B, D = z0.shape
    w1_full = params["w1"]                                    # (D + 1, H)
    H = w1_full.shape[1]

    # Weight prep (tiny, once per call, outside the kernel).
    ffw_row = params["ffw"].reshape(1, D).astype(jnp.float32)     # (1, D)
    w1c = w1_full[:1, :].astype(jnp.float32)                      # (1, H) ctx row
    w1d = w1_full[1:, :].astype(jnp.bfloat16)                     # (D, H) bf16 MXU operand
    b1 = params["b1"].reshape(1, H).astype(jnp.float32)           # (1, H)
    w2_row = params["w2"].reshape(1, H).astype(jnp.float32)       # (1, H)
    ffb = params["ffb"].reshape(1, 1).astype(jnp.float32)         # SMEM scalar
    b2 = params["b2"].reshape(1, 1).astype(jnp.float32)           # SMEM scalar

    # Hidden-dim chunking (lane-aligned); fall back to a single chunk if H
    # doesn't split cleanly.
    if h_chunk >= H or H % h_chunk != 0 or h_chunk % 128 != 0:
        h_chunk = H
    n_chunks = H // h_chunk

    # Batch tile: big enough to amortize per-step overhead, but keep >= 2 grid
    # steps when B allows so the "parallel" axis can shard across v7x's 2 TCs.
    if B <= 8:
        tb = B
    else:
        tb = min(block_b, _round_up(pl.cdiv(B, 2), 8))
    grid = (pl.cdiv(B, tb),)

    def tile(shape):        # per-grid-step activation / output tile
        return pl.BlockSpec(shape, lambda i: (i, 0))

    def resident(shape):    # VMEM-resident weights (same block every step)
        # Constant index_map => fetched once; default double-buffering of
        # these small blocks is a negligible VMEM cost at these sizes, so we
        # skip pipeline_mode=pl.Buffered(1) for lowering robustness.
        return pl.BlockSpec(shape, lambda i: (0, 0))

    smem_scalar = pl.BlockSpec(memory_space=pltpu.MemorySpace.SMEM)

    # Raise the scoped VMEM limit only if the estimated footprint needs it
    # (never triggers at the default tile sizes).
    est_vmem = (2 * 2 * tb * D * 4                       # z0/z1 double-buffered
                + 2 * tb * 4                             # output column (x2)
                + 2 * (D * H * 2 + 3 * H * 4 + D * 4)    # resident weights
                + 2 * tb * h_chunk * 4)                  # hidden chunk temps
    compiler_kwargs = dict(dimension_semantics=("parallel",))
    if est_vmem > (28 << 20):
        compiler_kwargs["vmem_limit_bytes"] = min(est_vmem + (8 << 20), 60 << 20)

    return pl.pallas_call(
        _make_kernel(h_chunk, n_chunks),
        out_shape=jax.ShapeDtypeStruct((B, 1), jnp.float32),
        grid=grid,
        in_specs=[
            tile((tb, D)),        # z0
            tile((tb, D)),        # z1
            resident((1, D)),     # ffw row
            smem_scalar,          # ffb (scalar)
            resident((1, H)),     # W1 context row
            resident((D, H)),     # W1 diff rows (bf16)
            resident((1, H)),     # b1
            resident((1, H)),     # w2 row
            smem_scalar,          # b2 (scalar)
        ],
        out_specs=tile((tb, 1)),
        compiler_params=pltpu.CompilerParams(**compiler_kwargs),
    )(z0, z1, ffw_row, ffb, w1c, w1d, b1, w2_row, b2)


def init_params(key, state_dim=128, hidden_dim=1024):
    ks = jax.random.split(key, 6)
    scale = 0.05
    return {
        # ff: Linear(state_dim, 1)
        "ffw": scale * jax.random.normal(ks[0], (state_dim, 1), jnp.float32),
        "ffb": scale * jax.random.normal(ks[1], (1, 1), jnp.float32),
        # body[0]: Linear(state_dim + 1, hidden_dim)
        "w1": scale * jax.random.normal(ks[2], (state_dim + 1, hidden_dim), jnp.float32),
        "b1": scale * jax.random.normal(ks[3], (1, hidden_dim), jnp.float32),
        # body[2]: Linear(hidden_dim, 1)
        "w2": scale * jax.random.normal(ks[4], (hidden_dim, 1), jnp.float32),
        "b2": scale * jax.random.normal(ks[5], (1, 1), jnp.float32),
    }


def reference_forward(z0, z1, p):
    ctx = jnp.maximum(z0 @ p["ffw"] + p["ffb"], 0.0)
    context = jnp.concatenate([ctx, z1 - z0], axis=-1)
    hidden = jnp.maximum(context @ p["w1"] + p["b1"], 0.0)
    return hidden @ p["w2"] + p["b2"]


if __name__ == "__main__":
    state_dim, hidden_dim, batch = 128, 1024, 16   # module defaults, small batch
    key = jax.random.PRNGKey(0)
    kp, k0, k1 = jax.random.split(key, 3)
    params = init_params(kp, state_dim, hidden_dim)
    z0 = jax.random.normal(k0, (batch, state_dim), jnp.float32)
    z1 = jax.random.normal(k1, (batch, state_dim), jnp.float32)

    # With B=16 the tile formula gives tb=8 -> a 2-step grid (exercises both
    # the pipeline and the H-chunk loop).
    pred = contrastive_forward(z0, z1, params)
    jax.block_until_ready(pred)

    ref = reference_forward(z0, z1, params)
    assert pred.shape == (batch, 1)
    # The W1 matmul uses bf16 operands with f32 accumulation, so compare
    # against the full-f32 reference with a correspondingly loosened tolerance.
    assert jnp.allclose(pred, ref, atol=3e-2, rtol=3e-2), "mismatch vs reference"
    print("KERNEL_OK")
</pallas_src>

<mosaic_0001>
module attributes {stable_mosaic.version = 11 : i64} {
  func.func @kernel(%arg0: i32, %arg1: memref<8x128xf32, #tpu.memory_space<vmem>>, %arg2: memref<8x128xf32, #tpu.memory_space<vmem>>, %arg3: memref<1x128xf32, #tpu.memory_space<vmem>>, %arg4: memref<1x1xf32, #tpu.memory_space<smem>>, %arg5: memref<1x1024xf32, #tpu.memory_space<vmem>>, %arg6: memref<128x1024xbf16, #tpu.memory_space<vmem>>, %arg7: memref<1x1024xf32, #tpu.memory_space<vmem>>, %arg8: memref<1x1024xf32, #tpu.memory_space<vmem>>, %arg9: memref<1x1xf32, #tpu.memory_space<smem>>, %arg10: memref<8x1xf32, #tpu.memory_space<vmem>>) attributes {dimension_semantics = [#tpu.dimension_semantics<parallel>], iteration_bounds = array<i64: 2>, scalar_prefetch = 0 : i64, scratch_operands = 0 : i64, tpu.core_type = #tpu.core_type<tc>, window_params = [{transform_indices = @transform_0, window_bounds = array<i64: 8, 128>}, {transform_indices = @transform_1, window_bounds = array<i64: 8, 128>}, {pipeline_mode = #tpu.pipeline_mode<synchronous>, transform_indices = @transform_2, window_bounds = array<i64: 1, 128>}, {transform_indices = @transform_3, window_bounds = array<i64: 1, 1>}, {pipeline_mode = #tpu.pipeline_mode<synchronous>, transform_indices = @transform_4, window_bounds = array<i64: 1, 1024>}, {pipeline_mode = #tpu.pipeline_mode<synchronous>, transform_indices = @transform_5, window_bounds = array<i64: 128, 1024>}, {pipeline_mode = #tpu.pipeline_mode<synchronous>, transform_indices = @transform_6, window_bounds = array<i64: 1, 1024>}, {pipeline_mode = #tpu.pipeline_mode<synchronous>, transform_indices = @transform_7, window_bounds = array<i64: 1, 1024>}, {transform_indices = @transform_8, window_bounds = array<i64: 1, 1>}, {transform_indices = @transform_9, window_bounds = array<i64: 8, 1>}]} {
    %c0 = arith.constant 0 : index
    %c0_0 = arith.constant 0 : index
    %0 = vector.load %arg1[%c0, %c0_0] : memref<8x128xf32, #tpu.memory_space<vmem>>, vector<8x128xf32>
    %c0_1 = arith.constant 0 : index
    %c0_2 = arith.constant 0 : index
    %1 = vector.load %arg2[%c0_1, %c0_2] : memref<8x128xf32, #tpu.memory_space<vmem>>, vector<8x128xf32>
    %c0_3 = arith.constant 0 : index
    %c0_4 = arith.constant 0 : index
    %2 = vector.load %arg3[%c0_3, %c0_4] : memref<1x128xf32, #tpu.memory_space<vmem>>, vector<1x128xf32>
    %3 = vector.broadcast %2 : vector<1x128xf32> to vector<8x128xf32>
    %4 = arith.mulf %0, %3 : vector<8x128xf32>
    %cst = arith.constant dense<0.000000e+00> : vector<8xf32>
    %5 = vector.multi_reduction <add>, %4, %cst [1] : vector<8x128xf32> to vector<8xf32>
    %6 = vector.shape_cast %5 : vector<8xf32> to vector<8x1xf32>
    %c0_5 = arith.constant 0 : index
    %c0_6 = arith.constant 0 : index
    %7 = memref.load %arg4[%c0_5, %c0_6] : memref<1x1xf32, #tpu.memory_space<smem>>
    %8 = vector.broadcast %7 : f32 to vector<8x1xf32>
    %9 = arith.addf %6, %8 : vector<8x1xf32>
    %cst_7 = arith.constant 0.000000e+00 : f32
    %10 = vector.broadcast %cst_7 : f32 to vector<8x1xf32>
    %11 = arith.maximumf %9, %10 : vector<8x1xf32>
    %12 = arith.subf %1, %0 : vector<8x128xf32>
    %13 = arith.truncf %12 : vector<8x128xf32> to vector<8x128xbf16>
    %cst_8 = arith.constant 0.000000e+00 : f32
    %14 = vector.broadcast %cst_8 : f32 to vector<8x1xf32>
    %c0_9 = arith.constant 0 : index
    %c0_10 = arith.constant 0 : index
    %15 = vector.load %arg6[%c0_9, %c0_10] : memref<128x1024xbf16, #tpu.memory_space<vmem>>, vector<128x256xbf16>
    %cst_11 = arith.constant dense<0.000000e+00> : vector<8x256xf32>
    %16 = tpu.matmul %13, %15, %cst_11 {dimension_numbers = #tpu.dot_dimension_numbers<[1], [0], [0], [1], [0, 0, 1, 1], [], []>} : vector<8x128xbf16>, vector<128x256xbf16>, vector<8x256xf32> -> vector<8x256xf32>
    %c0_12 = arith.constant 0 : index
    %c0_13 = arith.constant 0 : index
    %17 = vector.load %arg5[%c0_12, %c0_13] : memref<1x1024xf32, #tpu.memory_space<vmem>>, vector<1x256xf32>
    %18 = vector.broadcast %11 : vector<8x1xf32> to vector<8x256xf32>
    %19 = vector.broadcast %17 : vector<1x256xf32> to vector<8x256xf32>
    %20 = arith.mulf %18, %19 : vector<8x256xf32>
    %21 = arith.addf %16, %20 : vector<8x256xf32>
    %c0_14 = arith.constant 0 : index
    %c0_15 = arith.constant 0 : index
    %22 = vector.load %arg7[%c0_14, %c0_15] : memref<1x1024xf32, #tpu.memory_space<vmem>>, vector<1x256xf32>
    %23 = vector.broadcast %22 : vector<1x256xf32> to vector<8x256xf32>
    %24 = arith.addf %21, %23 : vector<8x256xf32>
    %cst_16 = arith.constant 0.000000e+00 : f32
    %25 = vector.broadcast %cst_16 : f32 to vector<8x256xf32>
    %26 = arith.maximumf %24, %25 : vector<8x256xf32>
    %c0_17 = arith.constant 0 : index
    %c0_18 = arith.constant 0 : index
    %27 = vector.load %arg8[%c0_17, %c0_18] : memref<1x1024xf32, #tpu.memory_space<vmem>>, vector<1x256xf32>
    %28 = vector.broadcast %27 : vector<1x256xf32> to vector<8x256xf32>
    %29 = arith.mulf %26, %28 : vector<8x256xf32>
    %cst_19 = arith.constant dense<0.000000e+00> : vector<8xf32>
    %30 = vector.multi_reduction <add>, %29, %cst_19 [1] : vector<8x256xf32> to vector<8xf32>
    %31 = vector.shape_cast %30 : vector<8xf32> to vector<8x1xf32>
    %32 = arith.addf %14, %31 : vector<8x1xf32>
    %c0_20 = arith.constant 0 : index
    %c256 = arith.constant 256 : index
    %33 = vector.load %arg6[%c0_20, %c256] : memref<128x1024xbf16, #tpu.memory_space<vmem>>, vector<128x256xbf16>
    %cst_21 = arith.constant dense<0.000000e+00> : vector<8x256xf32>
    %34 = tpu.matmul %13, %33, %cst_21 {dimension_numbers = #tpu.dot_dimension_numbers<[1], [0], [0], [1], [0, 0, 1, 1], [], []>} : vector<8x128xbf16>, vector<128x256xbf16>, vector<8x256xf32> -> vector<8x256xf32>
    %c0_22 = arith.constant 0 : index
    %c256_23 = arith.constant 256 : index
    %35 = vector.load %arg5[%c0_22, %c256_23] : memref<1x1024xf32, #tpu.memory_space<vmem>>, vector<1x256xf32>
    %36 = vector.broadcast %11 : vector<8x1xf32> to vector<8x256xf32>
    %37 = vector.broadcast %35 : vector<1x256xf32> to vector<8x256xf32>
    %38 = arith.mulf %36, %37 : vector<8x256xf32>
    %39 = arith.addf %34, %38 : vector<8x256xf32>
    %c0_24 = arith.constant 0 : index
    %c256_25 = arith.constant 256 : index
    %40 = vector.load %arg7[%c0_24, %c256_25] : memref<1x1024xf32, #tpu.memory_space<vmem>>, vector<1x256xf32>
    %41 = vector.broadcast %40 : vector<1x256xf32> to vector<8x256xf32>
    %42 = arith.addf %39, %41 : vector<8x256xf32>
    %cst_26 = arith.constant 0.000000e+00 : f32
    %43 = vector.broadcast %cst_26 : f32 to vector<8x256xf32>
    %44 = arith.maximumf %42, %43 : vector<8x256xf32>
    %c0_27 = arith.constant 0 : index
    %c256_28 = arith.constant 256 : index
    %45 = vector.load %arg8[%c0_27, %c256_28] : memref<1x1024xf32, #tpu.memory_space<vmem>>, vector<1x256xf32>
    %46 = vector.broadcast %45 : vector<1x256xf32> to vector<8x256xf32>
    %47 = arith.mulf %44, %46 : vector<8x256xf32>
    %cst_29 = arith.constant dense<0.000000e+00> : vector<8xf32>
    %48 = vector.multi_reduction <add>, %47, %cst_29 [1] : vector<8x256xf32> to vector<8xf32>
    %49 = vector.shape_cast %48 : vector<8xf32> to vector<8x1xf32>
    %50 = arith.addf %32, %49 : vector<8x1xf32>
    %c0_30 = arith.constant 0 : index
    %c512 = arith.constant 512 : index
    %51 = vector.load %arg6[%c0_30, %c512] : memref<128x1024xbf16, #tpu.memory_space<vmem>>, vector<128x256xbf16>
    %cst_31 = arith.constant dense<0.000000e+00> : vector<8x256xf32>
    %52 = tpu.matmul %13, %51, %cst_31 {dimension_numbers = #tpu.dot_dimension_numbers<[1], [0], [0], [1], [0, 0, 1, 1], [], []>} : vector<8x128xbf16>, vector<128x256xbf16>, vector<8x256xf32> -> vector<8x256xf32>
    %c0_32 = arith.constant 0 : index
    %c512_33 = arith.constant 512 : index
    %53 = vector.load %arg5[%c0_32, %c512_33] : memref<1x1024xf32, #tpu.memory_space<vmem>>, vector<1x256xf32>
    %54 = vector.broadcast %11 : vector<8x1xf32> to vector<8x256xf32>
    %55 = vector.broadcast %53 : vector<1x256xf32> to vector<8x256xf32>
    %56 = arith.mulf %54, %55 : vector<8x256xf32>
    %57 = arith.addf %52, %56 : vector<8x256xf32>
    %c0_34 = arith.constant 0 : index
    %c512_35 = arith.constant 512 : index
    %58 = vector.load %arg7[%c0_34, %c512_35] : memref<1x1024xf32, #tpu.memory_space<vmem>>, vector<1x256xf32>
    %59 = vector.broadcast %58 : vector<1x256xf32> to vector<8x256xf32>
    %60 = arith.addf %57, %59 : vector<8x256xf32>
    %cst_36 = arith.constant 0.000000e+00 : f32
    %61 = vector.broadcast %cst_36 : f32 to vector<8x256xf32>
    %62 = arith.maximumf %60, %61 : vector<8x256xf32>
    %c0_37 = arith.constant 0 : index
    %c512_38 = arith.constant 512 : index
    %63 = vector.load %arg8[%c0_37, %c512_38] : memref<1x1024xf32, #tpu.memory_space<vmem>>, vector<1x256xf32>
    %64 = vector.broadcast %63 : vector<1x256xf32> to vector<8x256xf32>
    %65 = arith.mulf %62, %64 : vector<8x256xf32>
    %cst_39 = arith.constant dense<0.000000e+00> : vector<8xf32>
    %66 = vector.multi_reduction <add>, %65, %cst_39 [1] : vector<8x256xf32> to vector<8xf32>
    %67 = vector.shape_cast %66 : vector<8xf32> to vector<8x1xf32>
    %68 = arith.addf %50, %67 : vector<8x1xf32>
    %c0_40 = arith.constant 0 : index
    %c768 = arith.constant 768 : index
    %69 = vector.load %arg6[%c0_40, %c768] : memref<128x1024xbf16, #tpu.memory_space<vmem>>, vector<128x256xbf16>
    %cst_41 = arith.constant dense<0.000000e+00> : vector<8x256xf32>
    %70 = tpu.matmul %13, %69, %cst_41 {dimension_numbers = #tpu.dot_dimension_numbers<[1], [0], [0], [1], [0, 0, 1, 1], [], []>} : vector<8x128xbf16>, vector<128x256xbf16>, vector<8x256xf32> -> vector<8x256xf32>
    %c0_42 = arith.constant 0 : index
    %c768_43 = arith.constant 768 : index
    %71 = vector.load %arg5[%c0_42, %c768_43] : memref<1x1024xf32, #tpu.memory_space<vmem>>, vector<1x256xf32>
    %72 = vector.broadcast %11 : vector<8x1xf32> to vector<8x256xf32>
    %73 = vector.broadcast %71 : vector<1x256xf32> to vector<8x256xf32>
    %74 = arith.mulf %72, %73 : vector<8x256xf32>
    %75 = arith.addf %70, %74 : vector<8x256xf32>
    %c0_44 = arith.constant 0 : index
    %c768_45 = arith.constant 768 : index
    %76 = vector.load %arg7[%c0_44, %c768_45] : memref<1x1024xf32, #tpu.memory_space<vmem>>, vector<1x256xf32>
    %77 = vector.broadcast %76 : vector<1x256xf32> to vector<8x256xf32>
    %78 = arith.addf %75, %77 : vector<8x256xf32>
    %cst_46 = arith.constant 0.000000e+00 : f32
    %79 = vector.broadcast %cst_46 : f32 to vector<8x256xf32>
    %80 = arith.maximumf %78, %79 : vector<8x256xf32>
    %c0_47 = arith.constant 0 : index
    %c768_48 = arith.constant 768 : index
    %81 = vector.load %arg8[%c0_47, %c768_48] : memref<1x1024xf32, #tpu.memory_space<vmem>>, vector<1x256xf32>
    %82 = vector.broadcast %81 : vector<1x256xf32> to vector<8x256xf32>
    %83 = arith.mulf %80, %82 : vector<8x256xf32>
    %cst_49 = arith.constant dense<0.000000e+00> : vector<8xf32>
    %84 = vector.multi_reduction <add>, %83, %cst_49 [1] : vector<8x256xf32> to vector<8xf32>
    %85 = vector.shape_cast %84 : vector<8xf32> to vector<8x1xf32>
    %86 = arith.addf %68, %85 : vector<8x1xf32>
    %c0_50 = arith.constant 0 : index
    %c0_51 = arith.constant 0 : index
    %87 = memref.load %arg9[%c0_50, %c0_51] : memref<1x1xf32, #tpu.memory_space<smem>>
    %88 = vector.broadcast %87 : f32 to vector<8x1xf32>
    %89 = arith.addf %86, %88 : vector<8x1xf32>
    %c0_52 = arith.constant 0 : index
    %c0_53 = arith.constant 0 : index
    %90 = vector.load %arg10[%c0_52, %c0_53] : memref<8x1xf32, #tpu.memory_space<vmem>>, vector<8x1xf32>
    tpu.vector_store %arg10[%c0_52, %c0_53], %89 {strides = array<i32>} : memref<8x1xf32, #tpu.memory_space<vmem>>, vector<8x1xf32>,
    return
  }
  func.func @transform_0(%arg0: i32) -> (i32, i32) {
    %c0_i32 = arith.constant 0 : i32
    %c0_i32_0 = arith.constant 0 : i32
    return %arg0, %c0_i32 : i32, i32
  }
  func.func @transform_1(%arg0: i32) -> (i32, i32) {
    %c0_i32 = arith.constant 0 : i32
    %c0_i32_0 = arith.constant 0 : i32
    return %arg0, %c0_i32 : i32, i32
  }
  func.func @transform_2(%arg0: i32) -> (i32, i32) {
    %c0_i32 = arith.constant 0 : i32
    %c0_i32_0 = arith.constant 0 : i32
    %c0_i32_1 = arith.constant 0 : i32
    return %c0_i32, %c0_i32_0 : i32, i32
  }
  func.func @transform_3(%arg0: i32) -> (i32, i32) {
    %c0_i32 = arith.constant 0 : i32
    %c0_i32_0 = arith.constant 0 : i32
    %c0_i32_1 = arith.constant 0 : i32
    return %c0_i32, %c0_i32_0 : i32, i32
  }
  func.func @transform_4(%arg0: i32) -> (i32, i32) {
    %c0_i32 = arith.constant 0 : i32
    %c0_i32_0 = arith.constant 0 : i32
    %c0_i32_1 = arith.constant 0 : i32
    return %c0_i32, %c0_i32_0 : i32, i32
  }
  func.func @transform_5(%arg0: i32) -> (i32, i32) {
    %c0_i32 = arith.constant 0 : i32
    %c0_i32_0 = arith.constant 0 : i32
    %c0_i32_1 = arith.constant 0 : i32
    return %c0_i32, %c0_i32_0 : i32, i32
  }
  func.func @transform_6(%arg0: i32) -> (i32, i32) {
    %c0_i32 = arith.constant 0 : i32
    %c0_i32_0 = arith.constant 0 : i32
    %c0_i32_1 = arith.constant 0 : i32
    return %c0_i32, %c0_i32_0 : i32, i32
  }
  func.func @transform_7(%arg0: i32) -> (i32, i32) {
    %c0_i32 = arith.constant 0 : i32
    %c0_i32_0 = arith.constant 0 : i32
    %c0_i32_1 = arith.constant 0 : i32
    return %c0_i32, %c0_i32_0 : i32, i32
  }
  func.func @transform_8(%arg0: i32) -> (i32, i32) {
    %c0_i32 = arith.constant 0 : i32
    %c0_i32_0 = arith.constant 0 : i32
    %c0_i32_1 = arith.constant 0 : i32
    return %c0_i32, %c0_i32_0 : i32, i32
  }
  func.func @transform_9(%arg0: i32) -> (i32, i32) {
    %c0_i32 = arith.constant 0 : i32
    %c0_i32_0 = arith.constant 0 : i32
    return %arg0, %c0_i32 : i32, i32
  }
}

</mosaic_0001>

<bundles_post_ra>
// kernel: tpu_custom_call.1
= control target key start
LH: loop header
LB: loop body
LE: loop exit
PB: predicated region body
PF: predicated region fallthrough
CT: control target
= control target key end

     0   :  { %s2132_s0 = inlined_call_operand.hbm [shape: f32[16,128], index: 0, kind: input, shape index: {}]   ;;  %s2133_s1 = inlined_call_operand.hbm [shape: f32[16,128], index: 1, kind: input, shape index: {}]   ;;  %s2134_s2 = inlined_call_operand.hbm [shape: f32[1,128], index: 2, kind: input, shape index: {}]   ;;  %s2135_s3 = inlined_call_operand.<no memory space> [shape: f32[1,1], index: 3, kind: input, shape index: {}]   ;;  %s2136_s4 = inlined_call_operand.hbm [shape: f32[1,1024], index: 4, kind: input, shape index: {}]   ;;  %s2137_s5 = inlined_call_operand.hbm [shape: bf16[128,1024], index: 5, kind: input, shape index: {}]   ;;  %s2138_s6 = inlined_call_operand.vmem [shape: f32[1,1024], index: 6, kind: input, shape index: {}]   ;;  %s2139_s7 = inlined_call_operand.hbm [shape: f32[1,1024], index: 7, kind: input, shape index: {}]   ;;  %s2140_s8 = inlined_call_operand.<no memory space> [shape: f32[1,1], index: 8, kind: input, shape index: {}]   ;;  %s2141_s9 = inlined_call_operand.vmem [shape: f32[16,1], index: 9, kind: output, shape index: {}]  }
   0x1   :  { %2142 = sst [smem:[#allocation19_spill]] %s2134_s2 }
   0x2   :  { %2143 = sst [smem:[#allocation20_spill]] %s2136_s4 }
   0x3   :  { %14 = sst [smem:[#allocation2]] %s2135_s3 }
   0x4   :  { %15 = sst [smem:[#allocation3]] %s2140_s8 }
   0x5   :  { %16 = vsyncpa [#allocation5], 0 }
   0x6   :  { %18 = vsyncpa [#allocation5 + $0x1], 0 }
   0x7   :  { %19 = vsyncpa [#allocation7], 0 }
   0x8   :  { %21 = vsyncpa [#allocation7 + $0x1], 0 }
   0x9   :  { %22 = vsyncpa [#allocation10], 0 }
   0xa   :  { %23 = vsyncpa [#allocation13], 0  ;;  %s1928_s13 = smov 0   ;;  %s1930_s14 = smov 0  }
   0xb   :  { %s1932_s15 = smov 0   ;;  %s1934_s16 = smov 0  }
   0xc LB: > { %s2144_s2 = sld [smem:[#allocation19_spill]]  ;;  %s1952_s18 = sadd.s32 4294967295, %s1864_s16   ;;  %s1864_s16 = sphi %s1934_s16, %s2153_s16   ;;  %s1860_s15 = sphi %s1932_s15, %s2152_s15   ;;  %s1856_s14 = sphi %s1930_s14, %s2151_s14   ;;  %s1852_s13 = sphi %s1928_s13, %s2150_s13  }
   0xd   : > { %p1206_p0 = scmp.ge.s32.totalorder %s1864_s16, 1  ;;  %p50_p1 = scmp.eq.s32.totalorder %s1952_s18, 0 }
   0xe   : > { %p259_p2 = scmp.lt.s32.totalorder %s1864_s16, 3  ;;  %s1866_s20 = smov [#allocation8]  }
   0xf   : > { %s273_s21 = sshll.u32 %s1866_s20, 4  ;;  %s2146_s4 = sld [smem:[#allocation20_spill]]  ;;  %s274_s21 = int_to_ptr.vmem [resolvable:$true] %s273_s21 }
  0x10   : > { %p1957_p3 = pnand %p1206_p0, %p259_p2  ;;  %s1867_s26 = smov [#allocation9]  }
  0x11   : > { %s288_s27 = sshll.u32 %s1867_s26, 4  ;;  %s297_s30 = sshll.u32 %s2137_s5, 4  ;;  %s289_s27 = int_to_ptr.vmem [resolvable:$true] %s288_s27  ;;  %s298_s30 = int_to_ptr.hbm [resolvable:$true] %s297_s30 }
  0x12   : > { %s271_s17 = sshll.u32 %s2144_s2, 4  ;;  %p1566_p4 = pneg %p1957_p3  ;;  %s272_s17 = int_to_ptr.hbm [resolvable:$true] %s271_s17 }
  0x13   : > { %s1868_s10 = smov [#allocation11]   ;;  %s315_s8 = sshll.u32 %s2139_s7, 4  ;;  %s316_s8 = int_to_ptr.hbm [resolvable:$true] %s315_s8 }
  0x14   : > { %p1968_p5 = pnand %p1566_p4, %p50_p1  ;;  %s299_s11 = sshll.u32 %s1868_s10, 4  ;;  %s300_s11 = int_to_ptr.vmem [resolvable:$true] %s299_s11 }
  0x15   : > { %s286_s24 = sshll.u32 %s2146_s4, 4  ;;  %s1869_s20 = smov 512   ;;  %s287_s24 = int_to_ptr.hbm [resolvable:$true] %s286_s24 }
  0x16   : > { %1569 = dma.hbm_to_vmem [thread:$0]  (!%p1968_p5), %s272_s17, 16, %s274_s21, [#allocation7]  }
  0x17   : > { %1572 = dma.hbm_to_vmem [thread:$0]  (!%p1968_p5), %s287_s24, 128, %s289_s27, [#allocation10]  }
  0x18   : > { %s1870_s22 = smov 32   ;;  %s1871_s17 = smov [#allocation12]  }
  0x19   : > { %1575 = dma.hbm_to_vmem [thread:$0]  (!%p1968_p5), %s298_s30, 8192, %s300_s11, [#allocation10], %s1869_s20, %s1869_s20, %s1870_s22  }
  0x1a   : > { %s317_s21 = sshll.u32 %s1871_s17, 4  ;;  %s1987_s23 = sadd.s32 1, %s1864_s16   ;;  %s318_s21 = int_to_ptr.vmem [resolvable:$true] %s317_s21 }
  0x1b   : > { %1578 = dma.hbm_to_vmem [thread:$0]  (!%p1968_p5), %s316_s8, 128, %s318_s21, [#allocation13]  }
  0x1c   : > { %s36_s24 = sadd.s32 1, %s1860_s15  ;;  %s33_s26 = ssub.s32 %s1864_s16, %s1987_s23 }
  0x1d   : > { %p43_p6 = scmp.ne.s32.totalorder %s1860_s15, %s1856_s14  ;;  %p34_p7 = scmp.eq.s32.totalorder %s33_s26, 0 }
  0x1e   : > { %p44_p8 = scmp.eq.s32.totalorder %s1864_s16, 0  ;;  %p49_p9 = scmp.ne.s32.totalorder %s1856_s14, %s1852_s13 }
  0x1f   : > { %p1590_p10 = scmp.lt.s32.totalorder %s1864_s16, 2  ;;  %s331_s25 = sand.u32 1, %s1860_s15  }
  0x20   : > { %s1999_s27 = scalar_select %p34_p7, %s1860_s15, %s36_s24  }
  0x21   : > { %p45_p11 = por %p44_p8, %p43_p6  ;;  %p2003_p12 = por %p50_p1, %p49_p9 }
  0x22   : > { %s1213_s29 = sshll.u32 %s1864_s16, 3  ;;  %s1212_s30 = sshll.u32 %s331_s25, 3 }
  0x23   : > { %s339_s12 = scalar_lea.hbm %s2132_s0, %s1213_s29  ;;  %s335_s8 = scalar_lea.vmem [#allocation4], %s1212_s30 }
  0x24   : > { %s341_s3 = sshll.u32 %s339_s12, 4  ;;  %s343_s13 = sshll.u32 %s335_s8, 4  ;;  %s342_s3 = int_to_ptr.hbm [resolvable:$true] %s341_s3  ;;  %s344_s13 = int_to_ptr.vmem [resolvable:$true] %s343_s13 }
  0x25   : > { %p2014_p13 = pnand %p1590_p10, %p45_p11  ;;  %s358_s21 = scalar_lea.hbm %s2133_s1, %s1213_s29 }
  0x26   : > { %s350_s24 = sand.u32 1, %s1864_s16   ;;  %s332_s26 = scalar_lea.sflag [#allocation5], %s331_s25 }
  0x27   : > { %s1754_s10 = sshra.s32 %s342_s3, 4  ;;  %p1758_p2 = pneg %p2014_p13  ;;  %s1755_s10 = int_to_ptr.hbm [resolvable:$true] %s1754_s10 }
  0x28   : > { %s1756_s11 = scalar_lea.hbm %s1755_s10, 8  ;;  %s1761_s2 = scalar_lea.hbm %s2132_s0, 16 }
  0x29   : > { %p1757_p0 = scmp.ne.s32.totalorder %s1755_s10, %s1756_s11  ;;  %p1762_p6 = scmp.lt.s32.totalorder %s1755_s10, %s2132_s0 }
  0x2a   : > { %p1763_p7 = scmp.lt.s32.totalorder %s1761_s2, %s1756_s11 }
  0x2b   : > { %p1759_p4 = pnand %p1758_p2, %p1757_p0 }
  0x2c   : > { %p1764_p8 = por %p1763_p7, %p1762_p6 }
  0x2d   : > { %p1760_p5 = pneg %p1759_p4 }
  0x2f   : > { %p1765_p9 = pnand %p1764_p8, %p1760_p5 }
  0x31   : > { %1768 = shalt.err (!%p1765_p9)
}
  0x32   : > { %1582 = dma.hbm_to_vmem [thread:$0]  (!%p2014_p13), %s342_s3, 128, %s344_s13, %s332_s26  }
  0x33   : > { %s360_s16 = sshll.u32 %s358_s21, 4  ;;  %s354_s25 = scalar_lea.vmem [#allocation6], %s1212_s30  ;;  %s361_s16 = int_to_ptr.hbm [resolvable:$true] %s360_s16 }
  0x34   : > { %s362_s29 = sshll.u32 %s354_s25, 4  ;;  %s351_s4 = scalar_lea.sflag [#allocation7], %s350_s24  ;;  %s363_s29 = int_to_ptr.vmem [resolvable:$true] %s362_s29 }
  0x35   : > { %s1784_s12 = sshra.s32 %s361_s16, 4  ;;  %s1791_s11 = scalar_lea.hbm %s2133_s1, 16  ;;  %s1785_s12 = int_to_ptr.hbm [resolvable:$true] %s1784_s12 }
  0x36   : > { %s1786_s8 = scalar_lea.hbm %s1785_s12, 8  ;;  %p1792_p4 = scmp.lt.s32.totalorder %s1785_s12, %s2133_s1 }
  0x37   : > { %p1787_p10 = scmp.ne.s32.totalorder %s1785_s12, %s1786_s8  ;;  %p1793_p5 = scmp.lt.s32.totalorder %s1791_s11, %s1786_s8 }
  0x39   : > { %p1789_p11 = pnand %p1787_p10, %p1758_p2  ;;  %p1794_p6 = por %p1793_p5, %p1792_p4 }
  0x3b   : > { %p1790_p0 = pneg %p1789_p11 }
  0x3d   : > { %p1795_p7 = pnand %p1794_p6, %p1790_p0 }
  0x3f   : > { %1798 = shalt.err (!%p1795_p7)
}
  0x40   : > { %1585 = dma.hbm_to_vmem [thread:$0]  (!%p2014_p13), %s361_s16, 128, %s363_s29, %s351_s4  }
  0x41   : > { %371 = sbr.rel (%p1957_p3) target bundleno = 412 (0x19c), region = 56  ;;  %s373_s30 = sand.u32 (!%p1957_p3), 1, %s1856_s14  }
  0x42   : > { %s2049_s13 = sshll.u32 (!%p1957_p3), %s373_s30, 3  ;;  %s374_s21 = scalar_lea.sflag (!%p1957_p3), [#allocation5], %s373_s30 }
  0x43   : > { %s377_s24 = scalar_lea.vmem (!%p1957_p3), [#allocation4], %s2049_s13 }
  0x46   : > { %1831 = dma.done.wait (%p2003_p12), %s374_s21, 128  }
  0x47   : > { %1833 = vsyncadd (%p2003_p12), %s374_s21, 4294967168  ;;  %s383_s4 = sand.u32 1, %s1952_s18   ;;  %s387_s19 = scalar_lea.vmem [#allocation6], %s2049_s13 }
  0x48   : > { %s384_s20 = scalar_lea.sflag [#allocation7], %s383_s4 }
  0x49   : > { %1835 = dma.done.wait (%p2003_p12), %s384_s20, 128  }
  0x4a   : > { %1837 = vsyncadd (%p2003_p12), %s384_s20, 4294967168 }
  0x4b   : > { %1839 = dma.done.wait (%p50_p1), [#allocation7], 16  }
  0x4c   : > { %1841 = vsyncadd (%p50_p1), [#allocation7], 4294967280 }
  0x4d   : > { %1843 = dma.done.wait (%p50_p1), [#allocation10], 8320  }
  0x4e   : > { %1845 = vsyncadd (%p50_p1), [#allocation10], 4294958976 }
  0x4f   : > { %1847 = dma.done.wait (%p50_p1), [#allocation13], 128  }
  0x50   : > { %1849 = vsyncadd (%p50_p1), [#allocation13], 4294967168  ;;  %v1282_v0 = vld [vmem:[#allocation11 + $0x1c0] sm:$0xf]  ;;  %v1496_v2 = vld [vmem:[#allocation11 + $0x1c4] sm:$0xf] }
  0x51   : > { %v1497_v1 = vld [vmem:[#allocation11 + $0x1dc] sm:$0xf0]  ;;  %v1284_v4 = vld [vmem:[#allocation11 + $0x1e0] sm:$0xf0]  ;;  %v1346_v5 = vld [vmem:[#allocation11 + $0x1c8] sm:$0xf] }
  0x52   : > { %v1283_v3 = vor.u32 %v1497_v1, %v1282_v0  ;;  %v1513_v6 = vld [vmem:[#allocation11 + $0x1e4] sm:$0xf0]  ;;  %v1287_v7 = vor.u32 %v1496_v2, %v1284_v4  ;;  %v1512_v9 = vld [vmem:[#allocation11 + $0x1cc] sm:$0xf]  ;;  %v1274_v11 = vld [vmem:[#allocation11 + $0x180] sm:$0xf] }
  0x53   : > { %v1347_v8 = vor.u32 %v1513_v6, %v1346_v5  ;;  %v1348_v10 = vld [vmem:[#allocation11 + $0x1e8] sm:$0xf0]  ;;  %v1495_v13 = vld [vmem:[#allocation11 + $0x19c] sm:$0xf0]  ;;  %v1494_v14 = vld [vmem:[#allocation11 + $0x184] sm:$0xf] }
  0x54   : > { %570 = vmatpush.bf16.msra.mxu0 %v1283_v3  ;;  %v1351_v12 = vor.u32 %v1512_v9, %v1348_v10  ;;  %v1276_v15 = vld [vmem:[#allocation11 + $0x1a0] sm:$0xf0]  ;;  %583 = vmatpush.bf16.msra.mxu1 %v1287_v7  ;;  %v1275_v16 = vor.u32 %v1495_v13, %v1274_v11  ;;  %v1338_v18 = vld [vmem:[#allocation11 + $0x188] sm:$0xf]  ;;  %v1510_v20 = vld [vmem:[#allocation11 + $0x18c] sm:$0xf] }
  0x55   : > { %722 = vmatpush.bf16.msra.mxu2 %v1347_v8  ;;  %v1279_v17 = vor.u32 %v1494_v14, %v1276_v15  ;;  %v1511_v19 = vld [vmem:[#allocation11 + $0x1a4] sm:$0xf0]  ;;  %v1340_v22 = vld [vmem:[#allocation11 + $0x1a8] sm:$0xf0]  ;;  %v1266_v23 = vld [vmem:[#allocation11 + $0x140] sm:$0xf] }
  0x56   : > { %735 = vmatpush.bf16.msra.mxu3 %v1351_v12  ;;  %v1339_v21 = vor.u32 %v1511_v19, %v1338_v18  ;;  %v1493_v24 = vld [vmem:[#allocation11 + $0x15c] sm:$0xf0]  ;;  %v1343_v25 = vor.u32 %v1510_v20, %v1340_v22  ;;  %v1492_v26 = vld [vmem:[#allocation11 + $0x144] sm:$0xf]  ;;  %v1330_v28 = vld [vmem:[#allocation11 + $0x148] sm:$0xf] }
  0x57   : > { %v1268_v27 = vld [vmem:[#allocation11 + $0x160] sm:$0xf0]  ;;  %v1267_v29 = vor.u32 %v1493_v24, %v1266_v23  ;;  %v1509_v30 = vld [vmem:[#allocation11 + $0x164] sm:$0xf0]  ;;  %v1508_v31 = vld [vmem:[#allocation11 + $0x14c] sm:$0xf] }
  0x58   : > { %571 = vmatpush.bf16.msra.mxu0 %v1275_v16  ;;  %v1332_v32 = vld [vmem:[#allocation11 + $0x168] sm:$0xf0]  ;;  %584 = vmatpush.bf16.msra.mxu1 %v1279_v17  ;;  %v1271_v33 = vor.u32 %v1492_v26, %v1268_v27  ;;  %v1331_v34 = vor.u32 %v1509_v30, %v1330_v28  ;;  %v1258_v35 = vld [vmem:[#allocation11 + $0x100] sm:$0xf]  ;;  %v1490_v37 = vld [vmem:[#allocation11 + $0x104] sm:$0xf] }
  0x59   : > { %723 = vmatpush.bf16.msra.mxu2 %v1339_v21  ;;  %v1491_v36 = vld [vmem:[#allocation11 + $0x11c] sm:$0xf0]  ;;  %v1335_v38 = vor.u32 %v1508_v31, %v1332_v32  ;;  %v1260_v39 = vld [vmem:[#allocation11 + $0x120] sm:$0xf0]  ;;  %v1322_v40 = vld [vmem:[#allocation11 + $0x108] sm:$0xf] }
  0x5a   : > { %736 = vmatpush.bf16.msra.mxu3 %v1343_v25  ;;  %v1507_v41 = vld [vmem:[#allocation11 + $0x124] sm:$0xf0]  ;;  %v1506_v42 = vld [vmem:[#allocation11 + $0x10c] sm:$0xf]  ;;  %v1259_v44 = vor.u32 %v1491_v36, %v1258_v35  ;;  %v1263_v45 = vor.u32 %v1490_v37, %v1260_v39  ;;  %v1250_v47 = vld [vmem:[#allocation11 + $0xc0] sm:$0xf] }
  0x5b   : > { %v1324_v43 = vld [vmem:[#allocation11 + $0x128] sm:$0xf0]  ;;  %v1323_v46 = vor.u32 %v1507_v41, %v1322_v40  ;;  %v1489_v48 = vld [vmem:[#allocation11 + $0xdc] sm:$0xf0]  ;;  %v1488_v49 = vld [vmem:[#allocation11 + $0xc4] sm:$0xf] }
  0x5c   : > { %572 = vmatpush.bf16.msra.mxu0 %v1267_v29  ;;  %585 = vmatpush.bf16.msra.mxu1 %v1271_v33  ;;  %v1327_v50 = vor.u32 %v1506_v42, %v1324_v43  ;;  %v1252_v51 = vld [vmem:[#allocation11 + $0xe0] sm:$0xf0]  ;;  %v1314_v52 = vld [vmem:[#allocation11 + $0xc8] sm:$0xf]  ;;  %v1504_v54 = vld [vmem:[#allocation11 + $0xcc] sm:$0xf]  ;;  %v1251_v56 = vor.u32 %v1489_v48, %v1250_v47 }
  0x5d   : > { %724 = vmatpush.bf16.msra.mxu2 %v1331_v34  ;;  %v1505_v53 = vld [vmem:[#allocation11 + $0xe4] sm:$0xf0]  ;;  %v1316_v55 = vld [vmem:[#allocation11 + $0xe8] sm:$0xf0]  ;;  %v1255_v57 = vor.u32 %v1488_v49, %v1252_v51  ;;  %v1242_v59 = vld [vmem:[#allocation11 + $0x80] sm:$0xf] }
  0x5e   : > { %737 = vmatpush.bf16.msra.mxu3 %v1335_v38  ;;  %v1315_v58 = vor.u32 %v1505_v53, %v1314_v52  ;;  %v1487_v60 = vld [vmem:[#allocation11 + $0x9c] sm:$0xf0]  ;;  %v1486_v61 = vld [vmem:[#allocation11 + $0x84] sm:$0xf]  ;;  %v1319_v62 = vor.u32 %v1504_v54, %v1316_v55  ;;  %v1306_v0 = vld [vmem:[#allocation11 + $0x88] sm:$0xf] }
  0x5f   : > { %v1244_v63 = vld [vmem:[#allocation11 + $0xa0] sm:$0xf0]  ;;  %v1503_v1 = vld [vmem:[#allocation11 + $0xa4] sm:$0xf0]  ;;  %v1502_v2 = vld [vmem:[#allocation11 + $0x8c] sm:$0xf]  ;;  %v1243_v4 = vor.u32 %v1487_v60, %v1242_v59 }
  0x60   : > { %573 = vmatpush.bf16.msra.mxu0 %v1259_v44  ;;  %586 = vmatpush.bf16.msra.mxu1 %v1263_v45  ;;  %v1308_v3 = vld [vmem:[#allocation11 + $0xa8] sm:$0xf0]  ;;  %v1247_v5 = vor.u32 %v1486_v61, %v1244_v63  ;;  %v1307_v6 = vor.u32 %v1503_v1, %v1306_v0  ;;  %v1234_v7 = vld [vmem:[#allocation11 + $0x40] sm:$0xf]  ;;  %v1484_v9 = vld [vmem:[#allocation11 + $0x44] sm:$0xf] }
  0x61   : > { %725 = vmatpush.bf16.msra.mxu2 %v1323_v46  ;;  %v1485_v8 = vld [vmem:[#allocation11 + $0x5c] sm:$0xf0]  ;;  %v1311_v10 = vor.u32 %v1502_v2, %v1308_v3  ;;  %v1236_v11 = vld [vmem:[#allocation11 + $0x60] sm:$0xf0]  ;;  %v1298_v12 = vld [vmem:[#allocation11 + $0x48] sm:$0xf] }
  0x62   : > { %738 = vmatpush.bf16.msra.mxu3 %v1327_v50  ;;  %v1501_v13 = vld [vmem:[#allocation11 + $0x64] sm:$0xf0]  ;;  %v1500_v14 = vld [vmem:[#allocation11 + $0x4c] sm:$0xf]  ;;  %v1226_v16 = vld [vmem:[#allocation11] sm:$0xf]  ;;  %v1235_v17 = vor.u32 %v1485_v8, %v1234_v7  ;;  %v1239_v21 = vor.u32 %v1484_v9, %v1236_v11 }
  0x63   : > { %v1300_v15 = vld [vmem:[#allocation11 + $0x68] sm:$0xf0]  ;;  %v1483_v18 = vld [vmem:[#allocation11 + $0x1c] sm:$0xf0]  ;;  %v1482_v19 = vld [vmem:[#allocation11 + $0x4] sm:$0xf]  ;;  %v1299_v22 = vor.u32 %v1501_v13, %v1298_v12 }
  0x64   : > { %574 = vmatpush.bf16.msra.mxu0 %v1251_v56  ;;  %587 = vmatpush.bf16.msra.mxu1 %v1255_v57  ;;  %v1228_v20 = vld [vmem:[#allocation11 + $0x20] sm:$0xf0]  ;;  %v1290_v23 = vld [vmem:[#allocation11 + $0x8] sm:$0xf]  ;;  %v1498_v25 = vld [vmem:[#allocation11 + $0xc] sm:$0xf]  ;;  %v1303_v26 = vor.u32 %v1500_v14, %v1300_v15  ;;  %v1227_v33 = vor.u32 %v1483_v18, %v1226_v16 }
  0x65   : > { %726 = vmatpush.bf16.msra.mxu2 %v1315_v58  ;;  %v1499_v24 = vld [vmem:[#allocation11 + $0x24] sm:$0xf0]  ;;  %v1292_v27 = vld [vmem:[#allocation11 + $0x28] sm:$0xf0]  ;;  %v1410_v28 = vld [vmem:[#allocation11 + $0x1d0] sm:$0xf]  ;;  %v1231_v37 = vor.u32 %v1482_v19, %v1228_v20 }
  0x66   : > { %739 = vmatpush.bf16.msra.mxu3 %v1319_v62  ;;  %v1529_v29 = vld [vmem:[#allocation11 + $0x1ec] sm:$0xf0]  ;;  %v1528_v30 = vld [vmem:[#allocation11 + $0x1d4] sm:$0xf]  ;;  %v1474_v34 = vld [vmem:[#allocation11 + $0x1d8] sm:$0xf]  ;;  %v1291_v38 = vor.u32 %v1499_v24, %v1290_v23  ;;  %v1295_v42 = vor.u32 %v1498_v25, %v1292_v27 }
  0x67   : > { %v1412_v31 = vld [vmem:[#allocation11 + $0x1f0] sm:$0xf0]  ;;  %v1545_v35 = vld [vmem:[#allocation11 + $0x1f4] sm:$0xf0]  ;;  %v1544_v39 = vld [vmem:[#allocation11 + $0x1dc] sm:$0xf]  ;;  %v1411_v43 = vor.u32 %v1529_v29, %v1410_v28 }
  0x68   : > { %575 = vmatpush.bf16.msra.mxu0 %v1243_v4  ;;  %588 = vmatpush.bf16.msra.mxu1 %v1247_v5  ;;  %v2076_v32 = vld [vmem:[%s377_s24] sm:$0xff]  ;;  %v452_v36 = vld [vmem:[%s387_s19] sm:$0xff]  ;;  %v1415_v44 = vor.u32 %v1528_v30, %v1412_v31  ;;  %v1475_v45 = vor.u32 %v1545_v35, %v1474_v34  ;;  %s460_s28 = sld [smem:[#allocation2]]  ;;  %p447_p1 = scmp.lt.s32.totalorder %s1952_s18, 1  ;;  %vm1077_vm0 = vcmask 7168  }
  0x69   : > { %727 = vmatpush.bf16.msra.mxu2 %v1307_v6  ;;  %v1476_v40 = vld [vmem:[#allocation11 + $0x1f8] sm:$0xf0]  ;;  %v464_v41 = vsub.f32 %v452_v36, %v2076_v32  ;;  %v1402_v46 = vld [vmem:[#allocation11 + $0x190] sm:$0xf]  ;;  %v1526_v48 = vld [vmem:[#allocation11 + $0x194] sm:$0xf] }
  0x6a   : > { %740 = vmatpush.bf16.msra.mxu3 %v1311_v10  ;;  %v1527_v47 = vld [vmem:[#allocation11 + $0x1ac] sm:$0xf0]  ;;  %v1479_v49 = vor.u32 %v1544_v39, %v1476_v40  ;;  %v1404_v50 = vld [vmem:[#allocation11 + $0x1b0] sm:$0xf0]  ;;  %v1466_v51 = vld [vmem:[#allocation11 + $0x198] sm:$0xf] }
  0x6b   : > { %v1543_v52 = vld [vmem:[#allocation11 + $0x1b4] sm:$0xf0]  ;;  %v2081_v53 = vpack.c.bf16 %v464_v41, %v464_v41  ;;  %v1542_v54 = vld [vmem:[#allocation11 + $0x19c] sm:$0xf]  ;;  %v1403_v56 = vor.u32 %v1527_v47, %v1402_v46  ;;  %v1407_v57 = vor.u32 %v1526_v48, %v1404_v50  ;;  %v1394_v59 = vld [vmem:[#allocation11 + $0x150] sm:$0xf] }
  0x6c   : > { %576 = vmatpush.bf16.msra.mxu0 %v1235_v17  ;;  %589 = vmatpush.bf16.msra.mxu1 %v1239_v21  ;;  %v1468_v55 = vld [vmem:[#allocation11 + $0x1b8] sm:$0xf0]  ;;  %v1467_v58 = vor.u32 %v1543_v52, %v1466_v51  ;;  %v1525_v60 = vld [vmem:[#allocation11 + $0x16c] sm:$0xf0]  ;;  %v1524_v61 = vld [vmem:[#allocation11 + $0x154] sm:$0xf] }
  0x6d   : > { %728 = vmatpush.bf16.msra.mxu2 %v1299_v22  ;;  %v1471_v62 = vor.u32 %v1542_v54, %v1468_v55  ;;  %v1396_v63 = vld [vmem:[#allocation11 + $0x170] sm:$0xf0]  ;;  %v1458_v0 = vld [vmem:[#allocation11 + $0x158] sm:$0xf]  ;;  %v1540_v2 = vld [vmem:[#allocation11 + $0x15c] sm:$0xf]  ;;  %v1395_v4 = vor.u32 %v1525_v60, %v1394_v59 }
  0x6e   : > { %741 = vmatpush.bf16.msra.mxu3 %v1303_v26  ;;  %v1541_v1 = vld [vmem:[#allocation11 + $0x174] sm:$0xf0]  ;;  %v1460_v3 = vld [vmem:[#allocation11 + $0x178] sm:$0xf0]  ;;  %v1386_v5 = vld [vmem:[#allocation11 + $0x110] sm:$0xf]  ;;  %v1399_v7 = vor.u32 %v1524_v61, %v1396_v63 }
  0x6f   : > { %v1523_v6 = vld [vmem:[#allocation11 + $0x12c] sm:$0xf0]  ;;  %v1459_v8 = vor.u32 %v1541_v1, %v1458_v0  ;;  %v1522_v9 = vld [vmem:[#allocation11 + $0x114] sm:$0xf]  ;;  %v1463_v11 = vor.u32 %v1540_v2, %v1460_v3  ;;  %v1450_v13 = vld [vmem:[#allocation11 + $0x118] sm:$0xf] }
  0x70   : > { %577 = vmatpush.bf16.msra.mxu0 %v1227_v33  ;;  %590 = vmatpush.bf16.msra.mxu1 %v1231_v37  ;;  %v1633_v10 = vld [vmem:[#allocation8] ss:$0 sm:$0xff]  ;;  %v1539_v14 = vld [vmem:[#allocation11 + $0x134] sm:$0xf0]  ;;  %v1538_v15 = vld [vmem:[#allocation11 + $0x11c] sm:$0xf]  ;;  %v1387_v18 = vor.u32 %v1523_v6, %v1386_v5 }
  0x71   : > { %729 = vmatpush.bf16.msra.mxu2 %v1291_v38  ;;  %v1388_v12 = vld [vmem:[#allocation11 + $0x130] sm:$0xf0]  ;;  %v1452_v16 = vld [vmem:[#allocation11 + $0x138] sm:$0xf0]  ;;  %v457_v17 = vmul.f32 %v1633_v10, %v2076_v32  ;;  %v1451_v20 = vor.u32 %v1539_v14, %v1450_v13  ;;  %v1378_v21 = vld [vmem:[#allocation11 + $0xd0] sm:$0xf] }
  0x72   : > { %742 = vmatpush.bf16.msra.mxu3 %v1295_v42  ;;  %v1391_v19 = vor.u32 %v1522_v9, %v1388_v12  ;;  %v1521_v22 = vld [vmem:[#allocation11 + $0xec] sm:$0xf0]  ;;  %v1520_v23 = vld [vmem:[#allocation11 + $0xd4] sm:$0xf]  ;;  %v1455_v24 = vor.u32 %v1538_v15, %v1452_v16  ;;  %v1442_v26 = vld [vmem:[#allocation11 + $0xd8] sm:$0xf] }
  0x73   : > { %578 = vmatmul.bf16.vlgmr.msra.gmra.mxu0 %v2081_v53  ;;  %591 = vmatmul.bf16.vlgmr.msra.gmra.mxu1 %v2081_v53  ;;  %v1380_v25 = vld [vmem:[#allocation11 + $0xf0] sm:$0xf0]  ;;  %v1537_v27 = vld [vmem:[#allocation11 + $0xf4] sm:$0xf0]  ;;  %v1536_v28 = vld [vmem:[#allocation11 + $0xdc] sm:$0xf]  ;;  %v1379_v30 = vor.u32 %v1521_v22, %v1378_v21 }
  0x74   : > { %874 = vmatpush.bf16.msrb.mxu0 %v1411_v43  ;;  %887 = vmatpush.bf16.msrb.mxu1 %v1415_v44  ;;  %v1444_v29 = vld [vmem:[#allocation11 + $0xf8] sm:$0xf0]  ;;  %v1383_v31 = vor.u32 %v1520_v23, %v1380_v25  ;;  %v1443_v32 = vor.u32 %v1537_v27, %v1442_v26  ;;  %v1370_v33 = vld [vmem:[#allocation11 + $0x90] sm:$0xf]  ;;  %v1518_v35 = vld [vmem:[#allocation11 + $0x94] sm:$0xf] }
  0x75   : > { %1026 = vmatpush.bf16.msrb.mxu2 %v1475_v45  ;;  %743 = vmatmul.bf16.vlgmr.msra.gmra.mxu3 %v2081_v53  ;;  %v1519_v34 = vld [vmem:[#allocation11 + $0xac] sm:$0xf0]  ;;  %v1447_v36 = vor.u32 %v1536_v28, %v1444_v29  ;;  %v1372_v37 = vld [vmem:[#allocation11 + $0xb0] sm:$0xf0]  ;;  %v1434_v38 = vld [vmem:[#allocation11 + $0x98] sm:$0xf] }
  0x76   : > { %1039 = vmatpush.bf16.msrb.mxu3 %v1479_v49  ;;  %730 = vmatmul.bf16.vlgmr.msra.gmra.mxu2 %v2081_v53  ;;  %v1535_v39 = vld [vmem:[#allocation11 + $0xb4] sm:$0xf0]  ;;  %v1534_v40 = vld [vmem:[#allocation11 + $0x9c] sm:$0xf]  ;;  %v1371_v42 = vor.u32 %v1519_v34, %v1370_v33  ;;  %v1375_v43 = vor.u32 %v1518_v35, %v1372_v37  ;;  %v1362_v45 = vld [vmem:[#allocation11 + $0x50] sm:$0xf] }
  0x77   : > { %458 = vadd.xlane.f32.xlu0 %v457_v17  ;;  %v1436_v41 = vld [vmem:[#allocation11 + $0xb8] sm:$0xf0]  ;;  %v1435_v44 = vor.u32 %v1535_v39, %v1434_v38  ;;  %v1517_v46 = vld [vmem:[#allocation11 + $0x6c] sm:$0xf0]  ;;  %v1516_v47 = vld [vmem:[#allocation11 + $0x54] sm:$0xf] }
  0x78   : > { %875 = vmatpush.bf16.msrb.mxu0 %v1403_v56  ;;  %888 = vmatpush.bf16.msrb.mxu1 %v1407_v57  ;;  %v1439_v48 = vor.u32 %v1534_v40, %v1436_v41  ;;  %v1364_v49 = vld [vmem:[#allocation11 + $0x70] sm:$0xf0]  ;;  %v1426_v50 = vld [vmem:[#allocation11 + $0x58] sm:$0xf]  ;;  %v1532_v52 = vld [vmem:[#allocation11 + $0x5c] sm:$0xf]  ;;  %v1363_v55 = vor.u32 %v1517_v46, %v1362_v45 }
  0x79   : > { %1027 = vmatpush.bf16.msrb.mxu2 %v1467_v58  ;;  %v1533_v51 = vld [vmem:[#allocation11 + $0x74] sm:$0xf0]  ;;  %v1428_v54 = vld [vmem:[#allocation11 + $0x78] sm:$0xf0]  ;;  %v1367_v56 = vor.u32 %v1516_v47, %v1364_v49  ;;  %v1354_v58 = vld [vmem:[#allocation11 + $0x10] sm:$0xf] }
  0x7a   : > { %1040 = vmatpush.bf16.msrb.mxu3 %v1471_v62  ;;  %v1427_v57 = vor.u32 %v1533_v51, %v1426_v50  ;;  %v1515_v59 = vld [vmem:[#allocation11 + $0x2c] sm:$0xf0]  ;;  %v1514_v60 = vld [vmem:[#allocation11 + $0x14] sm:$0xf]  ;;  %v1431_v61 = vor.u32 %v1532_v52, %v1428_v54  ;;  %v1418_v63 = vld [vmem:[#allocation11 + $0x18] sm:$0xf] }
  0x7b   : > { %v1356_v62 = vld [vmem:[#allocation11 + $0x30] sm:$0xf0]  ;;  %v1531_v0 = vld [vmem:[#allocation11 + $0x34] sm:$0xf0]  ;;  %v1530_v1 = vld [vmem:[#allocation11 + $0x1c] sm:$0xf]  ;;  %v1355_v3 = vor.u32 %v1515_v59, %v1354_v58 }
  0x7c   : > { %876 = vmatpush.bf16.msrb.mxu0 %v1395_v4  ;;  %889 = vmatpush.bf16.msrb.mxu1 %v1399_v7  ;;  %v1420_v2 = vld [vmem:[#allocation11 + $0x38] sm:$0xf0]  ;;  %v1359_v4 = vor.u32 %v1514_v60, %v1356_v62  ;;  %v1419_v5 = vor.u32 %v1531_v0, %v1418_v63  ;;  %v461_v7 = vstv %s460_s28  ;;  %v482_v9 = vld [vmem:[#allocation9] sm:$0x3]  ;;  %v596_v15 = vld [vmem:[%s2138_s6] sm:$0x3] }
  0x7d   : > { %1028 = vmatpush.bf16.msrb.mxu2 %v1459_v8  ;;  %v1423_v6 = vor.u32 %v1530_v1, %v1420_v2  ;;  %v634_v8 = vld [vmem:[#allocation9 + $0x2] sm:$0x3]  ;;  %v484_v13 = vperm.slane %v482_v9, 0  ;;  %v485_v14 = vperm.slane %v482_v9, 1  ;;  %v606_v25 = vld [vmem:[#allocation12] sm:$0x3] }
  0x7e   : > { %1041 = vmatpush.bf16.msrb.mxu3 %v1463_v11  ;;  %v636_v12 = vperm.slane %v634_v8, 0  ;;  %v637_v16 = vperm.slane %v634_v8, 1  ;;  %v608_v33 = vperm.slane %v606_v25, 0  ;;  %v609_v38 = vperm.slane %v606_v25, 1  ;;  %v786_v59 = vld [vmem:[#allocation9 + $0x4] sm:$0x3] }
  0x7f   : > { %v788_v60 = vperm.slane %v786_v59, 0  ;;  %v789_v62 = vperm.slane %v786_v59, 1  ;;  %v938_v1 = vld [vmem:[#allocation9 + $0x6] sm:$0x3]  ;;  %s1074_s10 = sld [smem:[#allocation3]]  ;;  %s2155_s18 = smov (!%p447_p1, %s1952_s18), 1 }
  0x80   : > { %877 = vmatpush.bf16.msrb.mxu0 %v1387_v18  ;;  %890 = vmatpush.bf16.msrb.mxu1 %v1391_v19  ;;  %v940_v9 = vperm.slane %v938_v1, 0  ;;  %s1223_s11 = sshll.u32 %s2155_s18, 3 }
  0x81   : > { %1029 = vmatpush.bf16.msrb.mxu2 %v1451_v20  ;;  %v598_v20 = vperm.slane %v596_v15, 0  ;;  %s450_s30 = scalar_lea.vmem %s2141_s9, %s1223_s11 }
  0x82   : > { %1042 = vmatpush.bf16.msrb.mxu3 %v1455_v24  ;;  %v599_v24 = vperm.slane %v596_v15, 1 }
  0x84   : > { %878 = vmatpush.bf16.msrb.mxu0 %v1379_v30  ;;  %891 = vmatpush.bf16.msrb.mxu1 %v1383_v31 }
  0x85   : > { %1030 = vmatpush.bf16.msrb.mxu2 %v1443_v32  ;;  %v758_v32 = vld [vmem:[#allocation12 + $0x2] sm:$0x3] }
  0x86   : > { %1043 = vmatpush.bf16.msrb.mxu3 %v1447_v36  ;;  %v761_v47 = vperm.slane %v758_v32, 1 }
  0x88   : > { %879 = vmatpush.bf16.msrb.mxu0 %v1371_v42  ;;  %892 = vmatpush.bf16.msrb.mxu1 %v1375_v43  ;;  %v760_v42 = vperm.slane %v758_v32, 0 }
  0x89   : > { %1031 = vmatpush.bf16.msrb.mxu2 %v1435_v44 }
  0x8a   : > { %1044 = vmatpush.bf16.msrb.mxu3 %v1439_v48 }
  0x8c   : > { %880 = vmatpush.bf16.msrb.mxu0 %v1363_v55  ;;  %893 = vmatpush.bf16.msrb.mxu1 %v1367_v56 }
  0x8d   : > { %1032 = vmatpush.bf16.msrb.mxu2 %v1427_v57 }
  0x8e   : > { %1045 = vmatpush.bf16.msrb.mxu3 %v1431_v61  ;;  %v900_v61 = vld [vmem:[%s2138_s6 + $0x4] sm:$0x3] }
  0x8f   : > { %v902_v0 = vperm.slane %v900_v61, 0 }
  0x90   : > { %881 = vmatpush.bf16.msrb.mxu0 %v1355_v3  ;;  %894 = vmatpush.bf16.msrb.mxu1 %v1359_v4  ;;  %v903_v4 = vperm.slane %v900_v61, 1 }
  0x91   : > { %1033 = vmatpush.bf16.msrb.mxu2 %v1419_v5  ;;  %v910_v5 = vld [vmem:[#allocation12 + $0x4] sm:$0x3] }
  0x92   : > { %1046 = vmatpush.bf16.msrb.mxu3 %v1423_v6  ;;  %v913_v15 = vperm.slane %v910_v5, 1 }
  0x93   : > { %882 = vmatmul.bf16.vlgmr.msrb.gmra.mxu0 %v2081_v53  ;;  %895 = vmatmul.bf16.vlgmr.msrb.gmra.mxu1 %v2081_v53 }
  0x94   : > { %1034 = vmatmul.bf16.vlgmr.msrb.gmra.mxu2 %v2081_v53 }
  0x95   : > { %1047 = vmatmul.bf16.vlgmr.msrb.gmra.mxu3 %v2081_v53  ;;  %v748_v53 = vld [vmem:[%s2138_s6 + $0x2] sm:$0x3] }
  0x96   : > { %v750_v27 = vperm.slane %v748_v53, 0  ;;  %v751_v31 = vperm.slane %v748_v53, 1 }
  0xea   : > { %v459_v10 = vpop.xlane.xlu0 %458 }
  0xeb   : > { %v462_v11 = vadd.f32 %v461_v7, %v459_v10 }
  0xed   : > { %v2095_v18 = vmax.f32 %v462_v11, 0.0  ;;  %v1052_v11 = vld [vmem:[%s2138_s6 + $0x6] sm:$0x3] }
  0xee   : > { %v1054_v53 = vperm.slane %v1052_v11, 0 }
  0xef   : > { %v640_v21 = vmul.f32 %v636_v12, %v2095_v18  ;;  %v488_v22 = vmul.f32 %v484_v13, %v2095_v18  ;;  %v489_v23 = vmul.f32 %v485_v14, %v2095_v18  ;;  %v641_v26 = vmul.f32 %v637_v16, %v2095_v18 }
  0xf0   : > { %v579_v17 = vpop.f32.mrf.mxu0  ;;  %v592_v19 = vpop.f32.mrf.mxu1  ;;  %v792_v63 = vmul.f32 %v788_v60, %v2095_v18  ;;  %v793_v3 = vmul.f32 %v789_v62, %v2095_v18  ;;  %v941_v12 = vperm.slane %v938_v1, 1  ;;  %v912_v13 = vperm.slane %v910_v5, 0 }
  0xf1   : > { %v580_v28 = vadd.f32 %v579_v17, %v488_v22  ;;  %v593_v29 = vadd.f32 %v592_v19, %v489_v23  ;;  %v944_v19 = vmul.f32 %v940_v9, %v2095_v18  ;;  %v1055_v22 = vperm.slane %v1052_v11, 1 }
  0xf3   : > { %v602_v36 = vadd.f32 %v598_v20, %v580_v28  ;;  %v603_v37 = vadd.f32 %v599_v24, %v593_v29  ;;  %v1062_v24 = vld [vmem:[#allocation12 + $0x6] sm:$0x3] }
  0xf5   : > { %v604_v43 = vmax.f32 %v602_v36, 0.0  ;;  %v605_v44 = vmax.f32 %v603_v37, 0.0 }
  0xf7   : > { %v612_v49 = vmul.f32 %v608_v33, %v604_v43  ;;  %v613_v50 = vmul.f32 %v609_v38, %v605_v44  ;;  %v1064_v33 = vperm.slane %v1062_v24, 0 }
  0xf8   : > { %v744_v34 = vpop.f32.mrf.mxu3  ;;  %v581_v40 = vpop.f32.mrf.mxu0 }
  0xf9   : > { %v731_v30 = vpop.f32.mrf.mxu2  ;;  %v745_v39 = vadd.f32 %v744_v34, %v641_v26  ;;  %v594_v45 = vpop.f32.mrf.mxu1  ;;  %v614_v54 = vadd.f32 %v613_v50, %v612_v49 }
  0xfa   : > { %v732_v35 = vadd.f32 %v731_v30, %v640_v21  ;;  %v945_v21 = vmul.f32 %v941_v12, %v2095_v18 }
  0xfb   : > { %v755_v46 = vadd.f32 %v751_v31, %v745_v39  ;;  %615 = vadd.xlane.f32.xlu0 %v614_v54 }
  0xfc   : > { %v754_v41 = vadd.f32 %v750_v27, %v732_v35  ;;  %v1065_v35 = vperm.slane %v1062_v24, 1 }
  0xfd   : > { %v757_v51 = vmax.f32 %v755_v46, 0.0 }
  0xfe   : > { %v756_v48 = vmax.f32 %v754_v41, 0.0 }
  0xff   : > { %v765_v56 = vmul.f32 %v761_v47, %v757_v51  ;;  %v1075_v47 = vstv %s1074_s10 }
 0x100   : > { %v764_v52 = vmul.f32 %v760_v42, %v756_v48  ;;  %v746_v57 = vpop.f32.mrf.mxu3 }
 0x101   : > { %v733_v55 = vpop.f32.mrf.mxu2 }
 0x102   : > { %v766_v58 = vadd.f32 %v765_v56, %v764_v52 }
 0x104   : > { %767 = vadd.xlane.f32.xlu1 %v766_v58 }
 0x110   : > { %v883_v2 = vpop.f32.mrf.mxu0  ;;  %v896_v7 = vpop.f32.mrf.mxu1 }
 0x111   : > { %v884_v6 = vadd.f32 %v883_v2, %v792_v63  ;;  %v897_v8 = vadd.f32 %v896_v7, %v793_v3 }
 0x113   : > { %v906_v10 = vadd.f32 %v902_v0, %v884_v6  ;;  %v907_v14 = vadd.f32 %v903_v4, %v897_v8 }
 0x115   : > { %v908_v16 = vmax.f32 %v906_v10, 0.0  ;;  %v909_v17 = vmax.f32 %v907_v14, 0.0 }
 0x117   : > { %v1035_v20 = vpop.f32.mrf.mxu2  ;;  %v916_v23 = vmul.f32 %v912_v13, %v908_v16  ;;  %v917_v28 = vmul.f32 %v913_v15, %v909_v17 }
 0x118   : > { %v1036_v25 = vadd.f32 %v1035_v20, %v944_v19  ;;  %v1048_v26 = vpop.f32.mrf.mxu3  ;;  %v885_v27 = vpop.f32.mrf.mxu0 }
 0x119   : > { %v1049_v29 = vadd.f32 %v1048_v26, %v945_v21  ;;  %v898_v30 = vpop.f32.mrf.mxu1  ;;  %v918_v32 = vadd.f32 %v917_v28, %v916_v23 }
 0x11a   : > { %v1058_v31 = vadd.f32 %v1054_v53, %v1036_v25 }
 0x11b   : > { %v1059_v34 = vadd.f32 %v1055_v22, %v1049_v29  ;;  %919 = vadd.xlane.f32.xlu1 %v918_v32 }
 0x11c   : > { %v1060_v36 = vmax.f32 %v1058_v31, 0.0 }
 0x11d   : > { %v1061_v37 = vmax.f32 %v1059_v34, 0.0 }
 0x11e   : > { %v1068_v18 = vmul.f32 %v1064_v33, %v1060_v36 }
 0x11f   : > { %v1037_v38 = vpop.f32.mrf.mxu2  ;;  %v1069_v39 = vmul.f32 %v1065_v35, %v1061_v37 }
 0x120   : > { %v1050_v40 = vpop.f32.mrf.mxu3 }
 0x121   : > { %v1070_v41 = vadd.f32 %v1069_v39, %v1068_v18 }
 0x123   : > { %1071 = vadd.xlane.f32.xlu2 %v1070_v41 }
 0x16e   : > { %v616_v43 = vpop.xlane.xlu0 %615 }
 0x177   : > { %v768_v42 = vpop.xlane.xlu1 %767 }
 0x178   : > { %v769_v45 = vadd.f32 %v768_v42, %v616_v43 }
 0x18e   : > { %v920_v44 = vpop.xlane.xlu1 %919 }
 0x18f   : > { %v921_v46 = vadd.f32 %v920_v44, %v769_v45 }
 0x196   : > { %v1072_v48 = vpop.xlane.xlu2 %1071 }
 0x197   : > { %v1073_v49 = vadd.f32 %v1072_v48, %v921_v46 }
 0x199   : > { %v1076_v50 = vadd.f32 %v1075_v47, %v1073_v49 }
 0x19b   : > { %1078 = vst.msk [vmem:[%s450_s30] sm:$0xff] %vm1077_vm0, %v1076_v50 }
 0x19c PF: > { %p26_p3 = scmp.ge.s32.totalorder %s1987_s23, 4   ;;  %s2150_s13 = smov %s1856_s14 }
 0x19d   : > { %s2151_s14 = smov %s1860_s15  ;;  %s2152_s15 = smov %s1999_s27 }
 0x19e   : > { %s2153_s16 = smov %s1987_s23  ;;  %28 = sbr.rel (!%p26_p3) target bundleno = 12 (0xc), region = 125 }
 0x1a3   :  { %1098 = vsyncpa [#allocation5], 1 }
 0x1a4   :  { %1100 = vsyncpa [#allocation5 + $0x1], 1 }
 0x1a5   :  { %1101 = vsyncpa [#allocation7], 1 }
 0x1a6   :  { %1103 = vsyncpa [#allocation7 + $0x1], 1 }
 0x1a7   :  { %1104 = vsyncpa [#allocation10], 1 }
 0x1a8   :  { %1105 = vsyncpa [#allocation13], 1 }

</bundles_post_ra>
